<compile_context>
chip_gen: v6e
topology: v6e:2x2x1
jax: 0.10.0
libtpu: 0.0.40
codegen_flags: <defaults>
</compile_context>

<pallas_src>
import functools

import jax
import jax.numpy as jnp
from jax.experimental import pallas as pl
from jax.experimental.pallas import tpu as pltpu

BN_EPS = 1e-5
LANE = 128
SUBLANE_BF16 = 16  # bf16 packs 16 rows per vreg


def _tabnet_decoder_kernel(x_ref, w1_ref, w234_ref, wo_ref, vec_ref, bo_ref,
                           out_ref, *, n_real):
    """Whole forward pass for one (small) batch, entirely VMEM-resident.

    vec_ref row layout: 0-3 = b1..b4, 4-7 = g1..g4, 8-11 = be1..be4.
    """
    b_pad = x_ref.shape[0]
    inv_n = jnp.float32(1.0 / n_real)

    # Row-validity mask (only materialized when the batch was padded): the
    # BatchNorm statistics must be computed over the real rows only.
    if n_real == b_pad:
        mask = None
    else:
        row_idx = jax.lax.broadcasted_iota(jnp.int32, (b_pad, 1), 0)
        mask = (row_idx < n_real).astype(jnp.float32)

    vecs = vec_ref[...]  # (12, hid_p) f32 -- one tiny load, sliced below

    def vrow(i):  # (1, hid_p)
        return vecs[i][None, :]

    def linear(h, w, b):
        # bf16 operands -> native MXU path, f32 accumulation, f32 bias add.
        return (jnp.dot(h.astype(jnp.bfloat16), w,
                        preferred_element_type=jnp.float32) + b)

    def act(h):
        return jnp.maximum(h, 0.0)  # ReLU

    def batchnorm(h, g, be):
        # One-pass training-mode BatchNorm1d statistics over the real rows.
        hm = h if mask is None else h * mask
        mean = jnp.sum(hm, axis=0, keepdims=True) * inv_n
        meansq = jnp.sum(hm * hm, axis=0, keepdims=True) * inv_n
        var = jnp.maximum(meansq - mean * mean, 0.0)  # clamp f32 cancellation
        scale = g * jax.lax.rsqrt(var + BN_EPS)
        shift = be - mean * scale
        return h * scale + shift  # single fused affine sweep

    x = x_ref[...]  # bf16 (b_pad, in_p)
    x1 = batchnorm(act(linear(x, w1_ref[...], vrow(0))), vrow(4), vrow(8))
    x2 = batchnorm(act(linear(x1, w234_ref[0], vrow(1))), vrow(5), vrow(9))
    x3 = batchnorm(act(linear(x1 + x2, w234_ref[1], vrow(2))), vrow(6), vrow(10))
    x4 = batchnorm(act(linear(x2 + x3, w234_ref[2], vrow(3))), vrow(7), vrow(11))
    out = linear(x3 + x4, wo_ref[...], bo_ref[...])
    out_ref[...] = out.astype(out_ref.dtype)


def _round_up(n, m):
    return ((n + m - 1) // m) * m


def _pad2(a, rows, cols):
    return jnp.pad(a, ((0, rows - a.shape[0]), (0, cols - a.shape[1])))


def _vmem_limit_bytes():
    """Generation-aware scoped-VMEM limit (v7x: 64 MiB physical; v5e/v6e: 128 MiB)."""
    try:
        info = pltpu.get_tpu_info()
        cap = getattr(info, "vmem_capacity_bytes", None)
        if cap:
            return int(min(100 << 20, (cap * 3) // 4))
    except Exception:
        pass
    return 48 << 20  # conservative fallback (safe on all generations)


def tabnet_decoder_forward(x, params):
    """params: dict with w1..w4, b1..b4, wo, bo, g1..g4, be1..be4 (all 2-D)."""
    batch, input_dim = x.shape
    hidden_dim = params["w1"].shape[1]
    output_dim = params["wo"].shape[1]

    in_p = _round_up(input_dim, LANE)
    hid_p = _round_up(hidden_dim, LANE)
    out_p = _round_up(output_dim, LANE)
    b_p = _round_up(batch, SUBLANE_BF16)

    # Lane-dense, zero-padded operands.  Zero-padded weight rows/cols, zero
    # biases and zero gamma/beta keep padded FEATURE columns exactly 0 through
    # the whole network (scale = gamma_pad * rsqrt(var+eps) = 0).  Padded
    # BATCH rows are excluded from BN statistics via the in-kernel mask and
    # sliced off after the call.
    x_p = _pad2(x, b_p, in_p).astype(jnp.bfloat16)

    w1 = _pad2(params["w1"], in_p, hid_p).astype(jnp.bfloat16)
    w234 = jnp.stack([
        _pad2(params["w2"], hid_p, hid_p),
        _pad2(params["w3"], hid_p, hid_p),
        _pad2(params["w4"], hid_p, hid_p),
    ]).astype(jnp.bfloat16)
    wo = _pad2(params["wo"], hid_p, out_p).astype(jnp.bfloat16)
    bo = _pad2(params["bo"], 1, out_p)

    vecs = jnp.concatenate([
        _pad2(params["b1"], 1, hid_p), _pad2(params["b2"], 1, hid_p),
        _pad2(params["b3"], 1, hid_p), _pad2(params["b4"], 1, hid_p),
        _pad2(params["g1"], 1, hid_p), _pad2(params["g2"], 1, hid_p),
        _pad2(params["g3"], 1, hid_p), _pad2(params["g4"], 1, hid_p),
        _pad2(params["be1"], 1, hid_p), _pad2(params["be2"], 1, hid_p),
        _pad2(params["be3"], 1, hid_p), _pad2(params["be4"], 1, hid_p),
    ], axis=0)  # (12, hid_p) f32

    kernel = functools.partial(_tabnet_decoder_kernel, n_real=batch)
    vmem_spec = pl.BlockSpec(memory_space=pltpu.MemorySpace.VMEM)
    out_padded = pl.pallas_call(
        kernel,
        out_shape=jax.ShapeDtypeStruct((b_p, out_p), jnp.float32),
        in_specs=[vmem_spec] * 6,
        out_specs=vmem_spec,
        compiler_params=pltpu.CompilerParams(
            vmem_limit_bytes=_vmem_limit_bytes()),
    )(x_p, w1, w234, wo, vecs, bo)
    return out_padded[:batch, :output_dim]


def init_params(key, input_dim, hidden_dim, output_dim):
    """Deterministic PyTorch-Linear-style init (U[-1/sqrt(fan_in), 1/sqrt(fan_in)])."""
    def linear_init(k, fan_in, fan_out):
        kw, kb = jax.random.split(k)
        bound = 1.0 / jnp.sqrt(jnp.float32(fan_in))
        w = jax.random.uniform(kw, (fan_in, fan_out), jnp.float32, -bound, bound)
        b = jax.random.uniform(kb, (1, fan_out), jnp.float32, -bound, bound)
        return w, b

    keys = jax.random.split(key, 5)
    w1, b1 = linear_init(keys[0], input_dim, hidden_dim)
    w2, b2 = linear_init(keys[1], hidden_dim, hidden_dim)
    w3, b3 = linear_init(keys[2], hidden_dim, hidden_dim)
    w4, b4 = linear_init(keys[3], hidden_dim, hidden_dim)
    wo, bo = linear_init(keys[4], hidden_dim, output_dim)

    ones = jnp.ones((1, hidden_dim), jnp.float32)
    zeros = jnp.zeros((1, hidden_dim), jnp.float32)
    return dict(
        w1=w1, b1=b1, w2=w2, b2=b2, w3=w3, b3=b3, w4=w4, b4=b4, wo=wo, bo=bo,
        g1=ones, be1=zeros, g2=ones, be2=zeros,
        g3=ones, be3=zeros, g4=ones, be4=zeros,
    )


def reference_forward(x, p):
    """Pure-JAX reference.

    Uses the same bf16-operand / f32-accumulate matmul numerics as the kernel
    (the intentional, bounded deviation from the pure-f32 PyTorch result), but
    the canonical two-pass BatchNorm formula over the real (unpadded) batch,
    so the kernel's masked one-pass-variance + fused-affine BN is checked
    against the textbook form.
    """
    def mm(h, w, b):
        return jnp.dot(h.astype(jnp.bfloat16), w.astype(jnp.bfloat16),
                       preferred_element_type=jnp.float32) + b

    def bn(h, g, b):
        m = jnp.mean(h, axis=0, keepdims=True)
        v = jnp.mean((h - m) ** 2, axis=0, keepdims=True)
        return (h - m) * jax.lax.rsqrt(v + BN_EPS) * g + b

    act = lambda h: jnp.maximum(h, 0.0)
    x1 = bn(act(mm(x, p["w1"], p["b1"])), p["g1"], p["be1"])
    x2 = bn(act(mm(x1, p["w2"], p["b2"])), p["g2"], p["be2"])
    x3 = bn(act(mm(x1 + x2, p["w3"], p["b3"])), p["g3"], p["be3"])
    x4 = bn(act(mm(x2 + x3, p["w4"], p["b4"])), p["g4"], p["be4"])
    return mm(x3 + x4, p["wo"], p["bo"])


if __name__ == "__main__":
    batch, input_dim, hidden_dim, output_dim = 8, 16, 32, 2

    key = jax.random.PRNGKey(0)
    k_x, k_p = jax.random.split(key)
    x = jax.random.normal(k_x, (batch, input_dim), jnp.float32)
    params = init_params(k_p, input_dim, hidden_dim, output_dim)

    out = jax.block_until_ready(jax.jit(tabnet_decoder_forward)(x, params))

    ref = reference_forward(x, params)
    assert out.shape == (batch, output_dim), out.shape
    assert jnp.allclose(out, ref, atol=1e-3, rtol=1e-3), float(
        jnp.max(jnp.abs(out - ref))
    )
    print("KERNEL_OK")
</pallas_src>

<mosaic_0001>
module attributes {stable_mosaic.version = 11 : i64} {
  func.func @_tabnet_decoder_kernel(%arg0: memref<16x128xbf16, #tpu.memory_space<vmem>>, %arg1: memref<128x128xbf16, #tpu.memory_space<vmem>>, %arg2: memref<3x128x128xbf16, #tpu.memory_space<vmem>>, %arg3: memref<128x128xbf16, #tpu.memory_space<vmem>>, %arg4: memref<12x128xf32, #tpu.memory_space<vmem>>, %arg5: memref<1x128xf32, #tpu.memory_space<vmem>>, %arg6: memref<16x128xf32, #tpu.memory_space<vmem>>) attributes {dimension_semantics = [], scalar_prefetch = 0 : i64, scratch_operands = 0 : i64, tpu.core_type = #tpu.core_type<tc>} {
    %0 = tpu.iota {dimensions = array<i32: 0>} : vector<16x1xi32>
    %c8_i32 = arith.constant 8 : i32
    %1 = vector.broadcast %c8_i32 : i32 to vector<16x1xi32>
    %2 = arith.cmpi slt, %0, %1 : vector<16x1xi32>
    %3 = arith.extui %2 : vector<16x1xi1> to vector<16x1xi32>
    %4 = arith.sitofp %3 : vector<16x1xi32> to vector<16x1xf32>
    %c0 = arith.constant 0 : index
    %c0_0 = arith.constant 0 : index
    %5 = vector.load %arg4[%c0, %c0_0] : memref<12x128xf32, #tpu.memory_space<vmem>>, vector<12x128xf32>
    %c0_1 = arith.constant 0 : index
    %c0_2 = arith.constant 0 : index
    %6 = vector.load %arg0[%c0_1, %c0_2] : memref<16x128xbf16, #tpu.memory_space<vmem>>, vector<16x128xbf16>
    %c0_3 = arith.constant 0 : index
    %c0_4 = arith.constant 0 : index
    %7 = vector.load %arg1[%c0_3, %c0_4] : memref<128x128xbf16, #tpu.memory_space<vmem>>, vector<128x128xbf16>
    %8 = vector.extract_strided_slice %5 {offsets = [0, 0], sizes = [1, 128], strides = [1, 1]} : vector<12x128xf32> to vector<1x128xf32>
    %9 = vector.shape_cast %8 : vector<1x128xf32> to vector<128xf32>
    %10 = vector.shape_cast %9 : vector<128xf32> to vector<1x128xf32>
    %cst = arith.constant dense<0.000000e+00> : vector<16x128xf32>
    %11 = tpu.matmul %6, %7, %cst {dimension_numbers = #tpu.dot_dimension_numbers<[1], [0], [0], [1], [0, 0, 1, 1], [], []>} : vector<16x128xbf16>, vector<128x128xbf16>, vector<16x128xf32> -> vector<16x128xf32>
    %12 = vector.broadcast %10 : vector<1x128xf32> to vector<16x128xf32>
    %13 = arith.addf %11, %12 : vector<16x128xf32>
    %cst_5 = arith.constant 0.000000e+00 : f32
    %14 = vector.broadcast %cst_5 : f32 to vector<16x128xf32>
    %15 = arith.maximumf %13, %14 : vector<16x128xf32>
    %16 = vector.extract_strided_slice %5 {offsets = [4, 0], sizes = [1, 128], strides = [1, 1]} : vector<12x128xf32> to vector<1x128xf32>
    %17 = vector.shape_cast %16 : vector<1x128xf32> to vector<128xf32>
    %18 = vector.shape_cast %17 : vector<128xf32> to vector<1x128xf32>
    %19 = vector.extract_strided_slice %5 {offsets = [8, 0], sizes = [1, 128], strides = [1, 1]} : vector<12x128xf32> to vector<1x128xf32>
    %20 = vector.shape_cast %19 : vector<1x128xf32> to vector<128xf32>
    %21 = vector.shape_cast %20 : vector<128xf32> to vector<1x128xf32>
    %22 = vector.broadcast %4 : vector<16x1xf32> to vector<16x128xf32>
    %23 = arith.mulf %15, %22 : vector<16x128xf32>
    %cst_6 = arith.constant dense<0.000000e+00> : vector<128xf32>
    %24 = vector.multi_reduction <add>, %23, %cst_6 [0] : vector<16x128xf32> to vector<128xf32>
    %25 = vector.shape_cast %24 : vector<128xf32> to vector<1x128xf32>
    %cst_7 = arith.constant 1.250000e-01 : f32
    %26 = vector.broadcast %cst_7 : f32 to vector<1x128xf32>
    %27 = arith.mulf %25, %26 : vector<1x128xf32>
    %28 = arith.mulf %23, %23 : vector<16x128xf32>
    %cst_8 = arith.constant dense<0.000000e+00> : vector<128xf32>
    %29 = vector.multi_reduction <add>, %28, %cst_8 [0] : vector<16x128xf32> to vector<128xf32>
    %30 = vector.shape_cast %29 : vector<128xf32> to vector<1x128xf32>
    %cst_9 = arith.constant 1.250000e-01 : f32
    %31 = vector.broadcast %cst_9 : f32 to vector<1x128xf32>
    %32 = arith.mulf %30, %31 : vector<1x128xf32>
    %33 = arith.mulf %27, %27 : vector<1x128xf32>
    %34 = arith.subf %32, %33 : vector<1x128xf32>
    %cst_10 = arith.constant 0.000000e+00 : f32
    %35 = vector.broadcast %cst_10 : f32 to vector<1x128xf32>
    %36 = arith.maximumf %34, %35 : vector<1x128xf32>
    %cst_11 = arith.constant 9.99999974E-6 : f32
    %37 = vector.broadcast %cst_11 : f32 to vector<1x128xf32>
    %38 = arith.addf %36, %37 : vector<1x128xf32>
    %39 = math.rsqrt %38 : vector<1x128xf32>
    %40 = arith.mulf %18, %39 : vector<1x128xf32>
    %41 = arith.mulf %27, %40 : vector<1x128xf32>
    %42 = arith.subf %21, %41 : vector<1x128xf32>
    %43 = vector.broadcast %40 : vector<1x128xf32> to vector<16x128xf32>
    %44 = arith.mulf %15, %43 : vector<16x128xf32>
    %45 = vector.broadcast %42 : vector<1x128xf32> to vector<16x128xf32>
    %46 = arith.addf %44, %45 : vector<16x128xf32>
    %c0_12 = arith.constant 0 : index
    %c0_13 = arith.constant 0 : index
    %c0_14 = arith.constant 0 : index
    %47 = vector.load %arg2[%c0_12, %c0_13, %c0_14] : memref<3x128x128xbf16, #tpu.memory_space<vmem>>, vector<1x128x128xbf16>
    %48 = vector.shape_cast %47 : vector<1x128x128xbf16> to vector<128x128xbf16>
    %49 = vector.extract_strided_slice %5 {offsets = [1, 0], sizes = [1, 128], strides = [1, 1]} : vector<12x128xf32> to vector<1x128xf32>
    %50 = vector.shape_cast %49 : vector<1x128xf32> to vector<128xf32>
    %51 = vector.shape_cast %50 : vector<128xf32> to vector<1x128xf32>
    %52 = arith.truncf %46 : vector<16x128xf32> to vector<16x128xbf16>
    %cst_15 = arith.constant dense<0.000000e+00> : vector<16x128xf32>
    %53 = tpu.matmul %52, %48, %cst_15 {dimension_numbers = #tpu.dot_dimension_numbers<[1], [0], [0], [1], [0, 0, 1, 1], [], []>} : vector<16x128xbf16>, vector<128x128xbf16>, vector<16x128xf32> -> vector<16x128xf32>
    %54 = vector.broadcast %51 : vector<1x128xf32> to vector<16x128xf32>
    %55 = arith.addf %53, %54 : vector<16x128xf32>
    %cst_16 = arith.constant 0.000000e+00 : f32
    %56 = vector.broadcast %cst_16 : f32 to vector<16x128xf32>
    %57 = arith.maximumf %55, %56 : vector<16x128xf32>
    %58 = vector.extract_strided_slice %5 {offsets = [5, 0], sizes = [1, 128], strides = [1, 1]} : vector<12x128xf32> to vector<1x128xf32>
    %59 = vector.shape_cast %58 : vector<1x128xf32> to vector<128xf32>
    %60 = vector.shape_cast %59 : vector<128xf32> to vector<1x128xf32>
    %61 = vector.extract_strided_slice %5 {offsets = [9, 0], sizes = [1, 128], strides = [1, 1]} : vector<12x128xf32> to vector<1x128xf32>
    %62 = vector.shape_cast %61 : vector<1x128xf32> to vector<128xf32>
    %63 = vector.shape_cast %62 : vector<128xf32> to vector<1x128xf32>
    %64 = vector.broadcast %4 : vector<16x1xf32> to vector<16x128xf32>
    %65 = arith.mulf %57, %64 : vector<16x128xf32>
    %cst_17 = arith.constant dense<0.000000e+00> : vector<128xf32>
    %66 = vector.multi_reduction <add>, %65, %cst_17 [0] : vector<16x128xf32> to vector<128xf32>
    %67 = vector.shape_cast %66 : vector<128xf32> to vector<1x128xf32>
    %cst_18 = arith.constant 1.250000e-01 : f32
    %68 = vector.broadcast %cst_18 : f32 to vector<1x128xf32>
    %69 = arith.mulf %67, %68 : vector<1x128xf32>
    %70 = arith.mulf %65, %65 : vector<16x128xf32>
    %cst_19 = arith.constant dense<0.000000e+00> : vector<128xf32>
    %71 = vector.multi_reduction <add>, %70, %cst_19 [0] : vector<16x128xf32> to vector<128xf32>
    %72 = vector.shape_cast %71 : vector<128xf32> to vector<1x128xf32>
    %cst_20 = arith.constant 1.250000e-01 : f32
    %73 = vector.broadcast %cst_20 : f32 to vector<1x128xf32>
    %74 = arith.mulf %72, %73 : vector<1x128xf32>
    %75 = arith.mulf %69, %69 : vector<1x128xf32>
    %76 = arith.subf %74, %75 : vector<1x128xf32>
    %cst_21 = arith.constant 0.000000e+00 : f32
    %77 = vector.broadcast %cst_21 : f32 to vector<1x128xf32>
    %78 = arith.maximumf %76, %77 : vector<1x128xf32>
    %cst_22 = arith.constant 9.99999974E-6 : f32
    %79 = vector.broadcast %cst_22 : f32 to vector<1x128xf32>
    %80 = arith.addf %78, %79 : vector<1x128xf32>
    %81 = math.rsqrt %80 : vector<1x128xf32>
    %82 = arith.mulf %60, %81 : vector<1x128xf32>
    %83 = arith.mulf %69, %82 : vector<1x128xf32>
    %84 = arith.subf %63, %83 : vector<1x128xf32>
    %85 = vector.broadcast %82 : vector<1x128xf32> to vector<16x128xf32>
    %86 = arith.mulf %57, %85 : vector<16x128xf32>
    %87 = vector.broadcast %84 : vector<1x128xf32> to vector<16x128xf32>
    %88 = arith.addf %86, %87 : vector<16x128xf32>
    %89 = arith.addf %46, %88 : vector<16x128xf32>
    %c1 = arith.constant 1 : index
    %c0_23 = arith.constant 0 : index
    %c0_24 = arith.constant 0 : index
    %90 = vector.load %arg2[%c1, %c0_23, %c0_24] : memref<3x128x128xbf16, #tpu.memory_space<vmem>>, vector<1x128x128xbf16>
    %91 = vector.shape_cast %90 : vector<1x128x128xbf16> to vector<128x128xbf16>
    %92 = vector.extract_strided_slice %5 {offsets = [2, 0], sizes = [1, 128], strides = [1, 1]} : vector<12x128xf32> to vector<1x128xf32>
    %93 = vector.shape_cast %92 : vector<1x128xf32> to vector<128xf32>
    %94 = vector.shape_cast %93 : vector<128xf32> to vector<1x128xf32>
    %95 = arith.truncf %89 : vector<16x128xf32> to vector<16x128xbf16>
    %cst_25 = arith.constant dense<0.000000e+00> : vector<16x128xf32>
    %96 = tpu.matmul %95, %91, %cst_25 {dimension_numbers = #tpu.dot_dimension_numbers<[1], [0], [0], [1], [0, 0, 1, 1], [], []>} : vector<16x128xbf16>, vector<128x128xbf16>, vector<16x128xf32> -> vector<16x128xf32>
    %97 = vector.broadcast %94 : vector<1x128xf32> to vector<16x128xf32>
    %98 = arith.addf %96, %97 : vector<16x128xf32>
    %cst_26 = arith.constant 0.000000e+00 : f32
    %99 = vector.broadcast %cst_26 : f32 to vector<16x128xf32>
    %100 = arith.maximumf %98, %99 : vector<16x128xf32>
    %101 = vector.extract_strided_slice %5 {offsets = [6, 0], sizes = [1, 128], strides = [1, 1]} : vector<12x128xf32> to vector<1x128xf32>
    %102 = vector.shape_cast %101 : vector<1x128xf32> to vector<128xf32>
    %103 = vector.shape_cast %102 : vector<128xf32> to vector<1x128xf32>
    %104 = vector.extract_strided_slice %5 {offsets = [10, 0], sizes = [1, 128], strides = [1, 1]} : vector<12x128xf32> to vector<1x128xf32>
    %105 = vector.shape_cast %104 : vector<1x128xf32> to vector<128xf32>
    %106 = vector.shape_cast %105 : vector<128xf32> to vector<1x128xf32>
    %107 = vector.broadcast %4 : vector<16x1xf32> to vector<16x128xf32>
    %108 = arith.mulf %100, %107 : vector<16x128xf32>
    %cst_27 = arith.constant dense<0.000000e+00> : vector<128xf32>
    %109 = vector.multi_reduction <add>, %108, %cst_27 [0] : vector<16x128xf32> to vector<128xf32>
    %110 = vector.shape_cast %109 : vector<128xf32> to vector<1x128xf32>
    %cst_28 = arith.constant 1.250000e-01 : f32
    %111 = vector.broadcast %cst_28 : f32 to vector<1x128xf32>
    %112 = arith.mulf %110, %111 : vector<1x128xf32>
    %113 = arith.mulf %108, %108 : vector<16x128xf32>
    %cst_29 = arith.constant dense<0.000000e+00> : vector<128xf32>
    %114 = vector.multi_reduction <add>, %113, %cst_29 [0] : vector<16x128xf32> to vector<128xf32>
    %115 = vector.shape_cast %114 : vector<128xf32> to vector<1x128xf32>
    %cst_30 = arith.constant 1.250000e-01 : f32
    %116 = vector.broadcast %cst_30 : f32 to vector<1x128xf32>
    %117 = arith.mulf %115, %116 : vector<1x128xf32>
    %118 = arith.mulf %112, %112 : vector<1x128xf32>
    %119 = arith.subf %117, %118 : vector<1x128xf32>
    %cst_31 = arith.constant 0.000000e+00 : f32
    %120 = vector.broadcast %cst_31 : f32 to vector<1x128xf32>
    %121 = arith.maximumf %119, %120 : vector<1x128xf32>
    %cst_32 = arith.constant 9.99999974E-6 : f32
    %122 = vector.broadcast %cst_32 : f32 to vector<1x128xf32>
    %123 = arith.addf %121, %122 : vector<1x128xf32>
    %124 = math.rsqrt %123 : vector<1x128xf32>
    %125 = arith.mulf %103, %124 : vector<1x128xf32>
    %126 = arith.mulf %112, %125 : vector<1x128xf32>
    %127 = arith.subf %106, %126 : vector<1x128xf32>
    %128 = vector.broadcast %125 : vector<1x128xf32> to vector<16x128xf32>
    %129 = arith.mulf %100, %128 : vector<16x128xf32>
    %130 = vector.broadcast %127 : vector<1x128xf32> to vector<16x128xf32>
    %131 = arith.addf %129, %130 : vector<16x128xf32>
    %132 = arith.addf %88, %131 : vector<16x128xf32>
    %c2 = arith.constant 2 : index
    %c0_33 = arith.constant 0 : index
    %c0_34 = arith.constant 0 : index
    %133 = vector.load %arg2[%c2, %c0_33, %c0_34] : memref<3x128x128xbf16, #tpu.memory_space<vmem>>, vector<1x128x128xbf16>
    %134 = vector.shape_cast %133 : vector<1x128x128xbf16> to vector<128x128xbf16>
    %135 = vector.extract_strided_slice %5 {offsets = [3, 0], sizes = [1, 128], strides = [1, 1]} : vector<12x128xf32> to vector<1x128xf32>
    %136 = vector.shape_cast %135 : vector<1x128xf32> to vector<128xf32>
    %137 = vector.shape_cast %136 : vector<128xf32> to vector<1x128xf32>
    %138 = arith.truncf %132 : vector<16x128xf32> to vector<16x128xbf16>
    %cst_35 = arith.constant dense<0.000000e+00> : vector<16x128xf32>
    %139 = tpu.matmul %138, %134, %cst_35 {dimension_numbers = #tpu.dot_dimension_numbers<[1], [0], [0], [1], [0, 0, 1, 1], [], []>} : vector<16x128xbf16>, vector<128x128xbf16>, vector<16x128xf32> -> vector<16x128xf32>
    %140 = vector.broadcast %137 : vector<1x128xf32> to vector<16x128xf32>
    %141 = arith.addf %139, %140 : vector<16x128xf32>
    %cst_36 = arith.constant 0.000000e+00 : f32
    %142 = vector.broadcast %cst_36 : f32 to vector<16x128xf32>
    %143 = arith.maximumf %141, %142 : vector<16x128xf32>
    %144 = vector.extract_strided_slice %5 {offsets = [7, 0], sizes = [1, 128], strides = [1, 1]} : vector<12x128xf32> to vector<1x128xf32>
    %145 = vector.shape_cast %144 : vector<1x128xf32> to vector<128xf32>
    %146 = vector.shape_cast %145 : vector<128xf32> to vector<1x128xf32>
    %147 = vector.extract_strided_slice %5 {offsets = [11, 0], sizes = [1, 128], strides = [1, 1]} : vector<12x128xf32> to vector<1x128xf32>
    %148 = vector.shape_cast %147 : vector<1x128xf32> to vector<128xf32>
    %149 = vector.shape_cast %148 : vector<128xf32> to vector<1x128xf32>
    %150 = vector.broadcast %4 : vector<16x1xf32> to vector<16x128xf32>
    %151 = arith.mulf %143, %150 : vector<16x128xf32>
    %cst_37 = arith.constant dense<0.000000e+00> : vector<128xf32>
    %152 = vector.multi_reduction <add>, %151, %cst_37 [0] : vector<16x128xf32> to vector<128xf32>
    %153 = vector.shape_cast %152 : vector<128xf32> to vector<1x128xf32>
    %cst_38 = arith.constant 1.250000e-01 : f32
    %154 = vector.broadcast %cst_38 : f32 to vector<1x128xf32>
    %155 = arith.mulf %153, %154 : vector<1x128xf32>
    %156 = arith.mulf %151, %151 : vector<16x128xf32>
    %cst_39 = arith.constant dense<0.000000e+00> : vector<128xf32>
    %157 = vector.multi_reduction <add>, %156, %cst_39 [0] : vector<16x128xf32> to vector<128xf32>
    %158 = vector.shape_cast %157 : vector<128xf32> to vector<1x128xf32>
    %cst_40 = arith.constant 1.250000e-01 : f32
    %159 = vector.broadcast %cst_40 : f32 to vector<1x128xf32>
    %160 = arith.mulf %158, %159 : vector<1x128xf32>
    %161 = arith.mulf %155, %155 : vector<1x128xf32>
    %162 = arith.subf %160, %161 : vector<1x128xf32>
    %cst_41 = arith.constant 0.000000e+00 : f32
    %163 = vector.broadcast %cst_41 : f32 to vector<1x128xf32>
    %164 = arith.maximumf %162, %163 : vector<1x128xf32>
    %cst_42 = arith.constant 9.99999974E-6 : f32
    %165 = vector.broadcast %cst_42 : f32 to vector<1x128xf32>
    %166 = arith.addf %164, %165 : vector<1x128xf32>
    %167 = math.rsqrt %166 : vector<1x128xf32>
    %168 = arith.mulf %146, %167 : vector<1x128xf32>
    %169 = arith.mulf %155, %168 : vector<1x128xf32>
    %170 = arith.subf %149, %169 : vector<1x128xf32>
    %171 = vector.broadcast %168 : vector<1x128xf32> to vector<16x128xf32>
    %172 = arith.mulf %143, %171 : vector<16x128xf32>
    %173 = vector.broadcast %170 : vector<1x128xf32> to vector<16x128xf32>
    %174 = arith.addf %172, %173 : vector<16x128xf32>
    %175 = arith.addf %131, %174 : vector<16x128xf32>
    %c0_43 = arith.constant 0 : index
    %c0_44 = arith.constant 0 : index
    %176 = vector.load %arg3[%c0_43, %c0_44] : memref<128x128xbf16, #tpu.memory_space<vmem>>, vector<128x128xbf16>
    %c0_45 = arith.constant 0 : index
    %c0_46 = arith.constant 0 : index
    %177 = vector.load %arg5[%c0_45, %c0_46] : memref<1x128xf32, #tpu.memory_space<vmem>>, vector<1x128xf32>
    %178 = arith.truncf %175 : vector<16x128xf32> to vector<16x128xbf16>
    %cst_47 = arith.constant dense<0.000000e+00> : vector<16x128xf32>
    %179 = tpu.matmul %178, %176, %cst_47 {dimension_numbers = #tpu.dot_dimension_numbers<[1], [0], [0], [1], [0, 0, 1, 1], [], []>} : vector<16x128xbf16>, vector<128x128xbf16>, vector<16x128xf32> -> vector<16x128xf32>
    %180 = vector.broadcast %177 : vector<1x128xf32> to vector<16x128xf32>
    %181 = arith.addf %179, %180 : vector<16x128xf32>
    %c0_48 = arith.constant 0 : index
    %c0_49 = arith.constant 0 : index
    %182 = vector.load %arg6[%c0_48, %c0_49] : memref<16x128xf32, #tpu.memory_space<vmem>>, vector<16x128xf32>
    tpu.vector_store %arg6[%c0_48, %c0_49], %181 {strides = array<i32>} : memref<16x128xf32, #tpu.memory_space<vmem>>, vector<16x128xf32>,
    return
  }
}

</mosaic_0001>

<bundles_post_ra>
// kernel: tabnet_decoder_forward.1
= control target key start
LH: loop header
LB: loop body
LE: loop exit
PB: predicated region body
PF: predicated region fallthrough
CT: control target
= control target key end

     0   :  { %v1059_v0 = vmov 0.0   ;;  %vm1060_vm0 = vmmov 0   ;;  %v53_v18 = vlaneseq  ;;  %s1334_s1 = inlined_call_operand.vmem [shape: bf16[128,128], index: 1, kind: input, shape index: {}]   ;;  %s1335_s0 = inlined_call_operand.vmem [shape: bf16[16,128], index: 0, kind: input, shape index: {}]   ;;  %s1336_s2 = inlined_call_operand.vmem [shape: bf16[3,128,128], index: 2, kind: input, shape index: {}]   ;;  %s1337_s4 = inlined_call_operand.vmem [shape: f32[12,128], index: 4, kind: input, shape index: {}]   ;;  %s1338_s3 = inlined_call_operand.vmem [shape: bf16[128,128], index: 3, kind: input, shape index: {}]   ;;  %s1339_s5 = inlined_call_operand.vmem [shape: f32[1,128], index: 5, kind: input, shape index: {}]   ;;  %s1340_s6 = inlined_call_operand.vmem [shape: f32[16,128], index: 6, kind: output, shape index: {}]  }
   0x1   :  { %908 = vmatprep.subr.bf16.mxu0 %v1059_v0  ;;  %v1010_v1 = vld [vmem:[%s1334_s1 + $0x38] sm:$0xff]   ;;  %924 = vmatprep.mubr.msk.bf16.mxu0 %vm1060_vm0, %v1059_v0  ;;  %v1011_v2 = vld [vmem:[%s1334_s1 + $0x30] sm:$0xff]   ;;  %v1012_v3 = vld [vmem:[%s1334_s1 + $0x28] sm:$0xff]  }
   0x2   :  { %928 = vmatprep.subr.bf16.mxu1 %v1059_v0  ;;  %944 = vmatprep.mubr.msk.bf16.mxu1 %vm1060_vm0, %v1059_v0  ;;  %v1013_v4 = vld [vmem:[%s1334_s1 + $0x20] sm:$0xff]   ;;  %v1014_v5 = vld [vmem:[%s1334_s1 + $0x18] sm:$0xff]   ;;  %v1015_v6 = vld [vmem:[%s1334_s1 + $0x10] sm:$0xff]   ;;  %v1171_v19 = vshrl.u32 %v53_v18, 7 }
   0x3   :  { %909 = vmatpush3.bf16.msra.mxu0 %v1010_v1  ;;  %v1016_v7 = vld [vmem:[%s1334_s1 + $0x8] sm:$0xff]   ;;  %v1017_v8 = vld [vmem:[%s1334_s1] sm:$0xff]   ;;  %v1019_v10 = vld [vmem:[%s1336_s2 + $0x38] sm:$0xff]  }
   0x4   :  { %910 = vmatprep.subr.bf16.mxu0 %v1059_v0  ;;  %v1018_v9 = vld [vmem:[%s1335_s0] sm:$0xff]   ;;  %929 = vmatpush3.bf16.msra.mxu1 %v1019_v10  ;;  %v1020_v11 = vld [vmem:[%s1336_s2 + $0x30] sm:$0xff]   ;;  %v1021_v12 = vld [vmem:[%s1336_s2 + $0x28] sm:$0xff]   ;;  %v55_v20 = vsub.s32 0, %v1171_v19  ;;  %v187_v56 = vsub.s32 4, %v1171_v19 }
   0x5   :  { %930 = vmatprep.subr.bf16.mxu1 %v1059_v0  ;;  %v1022_v13 = vld [vmem:[%s1336_s2 + $0x20] sm:$0xff]   ;;  %v1023_v14 = vld [vmem:[%s1336_s2 + $0x18] sm:$0xff]   ;;  %v1024_v15 = vld [vmem:[%s1336_s2 + $0x10] sm:$0xff]  }
   0x6   :  { %v1025_v16 = vld [vmem:[%s1336_s2 + $0x8] sm:$0xff]   ;;  %v1026_v17 = vld [vmem:[%s1336_s2] sm:$0xff]   ;;  %v1032_v10 = vld [vmem:[%s1336_s2 + $0x50] sm:$0xff]  }
   0x7   :  { %911 = vmatpush3.bf16.msra.mxu0 %v1011_v2  ;;  %v1177_v21 = vld [vmem:[%s1337_s4] sm:$0xff]  ;;  %v1185_v58 = vld [vmem:[%s1337_s4 + $0x8] sm:$0xf] }
   0x8   :  { %912 = vmatprep.subr.bf16.mxu0 %v1059_v0  ;;  %931 = vmatpush3.bf16.msra.mxu1 %v1020_v11  ;;  %v56_v22 = vrot.slane %v1177_v21, %v55_v20  ;;  %v1033_v11 = vld [vmem:[%s1336_s2 + $0x48] sm:$0xff]  }
   0x9   :  { %932 = vmatprep.subr.bf16.mxu1 %v1059_v0 }
   0xb   :  { %913 = vmatpush3.bf16.msra.mxu0 %v1012_v3 }
   0xc   :  { %914 = vmatprep.subr.bf16.mxu0 %v1059_v0  ;;  %933 = vmatpush3.bf16.msra.mxu1 %v1021_v12  ;;  %v1034_v12 = vld [vmem:[%s1336_s2 + $0x40] sm:$0xff]  }
   0xd   :  { %934 = vmatprep.subr.bf16.mxu1 %v1059_v0 }
   0xf   :  { %915 = vmatpush3.bf16.msra.mxu0 %v1013_v4 }
  0x10   :  { %916 = vmatprep.subr.bf16.mxu0 %v1059_v0  ;;  %935 = vmatpush3.bf16.msra.mxu1 %v1022_v13  ;;  %v216_v13 = vsub.s32 1, %v1171_v19 }
  0x11   :  { %936 = vmatprep.subr.bf16.mxu1 %v1059_v0 }
  0x13   :  { %917 = vmatpush3.bf16.msra.mxu0 %v1014_v5  ;;  %v1027_v5 = vld [vmem:[%s1336_s2 + $0x78] sm:$0xff]  }
  0x14   :  { %918 = vmatprep.subr.bf16.mxu0 %v1059_v0  ;;  %937 = vmatpush3.bf16.msra.mxu1 %v1023_v14  ;;  %v217_v14 = vrot.slane %v1177_v21, %v216_v13 }
  0x15   :  { %938 = vmatprep.subr.bf16.mxu1 %v1059_v0 }
  0x17   :  { %919 = vmatpush3.bf16.msra.mxu0 %v1015_v6  ;;  %v1028_v6 = vld [vmem:[%s1336_s2 + $0x70] sm:$0xff]  }
  0x18   :  { %920 = vmatprep.subr.bf16.mxu0 %v1059_v0  ;;  %939 = vmatpush3.bf16.msra.mxu1 %v1024_v15 }
  0x19   :  { %940 = vmatprep.subr.bf16.mxu1 %v1059_v0 }
  0x1b   :  { %921 = vmatpush3.bf16.msra.mxu0 %v1016_v7  ;;  %v1029_v7 = vld [vmem:[%s1336_s2 + $0x68] sm:$0xff]  }
  0x1c   :  { %922 = vmatprep.subr.bf16.mxu0 %v1059_v0  ;;  %941 = vmatpush3.bf16.msra.mxu1 %v1025_v16 }
  0x1d   :  { %942 = vmatprep.subr.bf16.mxu1 %v1059_v0 }
  0x1f   :  { %923 = vmatpush3.bf16.msra.mxu0 %v1017_v8  ;;  %v1030_v8 = vld [vmem:[%s1336_s2 + $0x60] sm:$0xff]  }
  0x20   :  { %948 = vmatprep.subr.bf16.mxu0 %v1059_v0  ;;  %943 = vmatpush3.bf16.msra.mxu1 %v1026_v17 }
  0x21   :  { %968 = vmatprep.subr.bf16.mxu1 %v1059_v0 }
  0x22   :  { %925 = vmatmul.mubr.bf16.vlgmr.msra.gmra.mxu0 %v1018_v9  ;;  %v1031_v9 = vld [vmem:[%s1336_s2 + $0x58] sm:$0xff]  }
  0x23   :  { %964 = vmatprep.mubr.msk.bf16.mxu0 %vm1060_vm0, %v1059_v0  ;;  %949 = vmatpush3.bf16.msra.mxu0 %v1027_v5  ;;  %v1039_v5 = vld [vmem:[%s1336_s2 + $0x98] sm:$0xff]  }
  0x24   :  { %950 = vmatprep.subr.bf16.mxu0 %v1059_v0 }
  0x27   :  { %951 = vmatpush3.bf16.msra.mxu0 %v1028_v6  ;;  %v1040_v6 = vld [vmem:[%s1336_s2 + $0x90] sm:$0xff]  }
  0x28   :  { %952 = vmatprep.subr.bf16.mxu0 %v1059_v0 }
  0x2b   :  { %953 = vmatpush3.bf16.msra.mxu0 %v1029_v7  ;;  %v1041_v7 = vld [vmem:[%s1336_s2 + $0x88] sm:$0xff]  }
  0x2c   :  { %954 = vmatprep.subr.bf16.mxu0 %v1059_v0 }
  0x2f   :  { %955 = vmatpush3.bf16.msra.mxu0 %v1030_v8  ;;  %v1042_v8 = vld [vmem:[%s1336_s2 + $0x80] sm:$0xff]  }
  0x30   :  { %956 = vmatprep.subr.bf16.mxu0 %v1059_v0 }
  0x33   :  { %957 = vmatpush3.bf16.msra.mxu0 %v1031_v9  ;;  %v374_v9 = vsub.s32 2, %v1171_v19 }
  0x34   :  { %958 = vmatprep.subr.bf16.mxu0 %v1059_v0 }
  0x37   :  { %959 = vmatpush3.bf16.msra.mxu0 %v1032_v10  ;;  %v375_v10 = vrot.slane %v1177_v21, %v374_v9 }
  0x38   :  { %960 = vmatprep.subr.bf16.mxu0 %v1059_v0 }
  0x3b   :  { %961 = vmatpush3.bf16.msra.mxu0 %v1033_v11 }
  0x3c   :  { %962 = vmatprep.subr.bf16.mxu0 %v1059_v0 }
  0x3f   :  { %963 = vmatpush3.bf16.msra.mxu0 %v1034_v12 }
  0x40   :  { %988 = vmatprep.subr.bf16.mxu0 %v1059_v0 }
  0xe2   :  { %v145_v23 = vpop.f32.mrf.mxu0 }
  0xe3   :  { %v146_v25 = vadd.f32 %v145_v23, %v56_v22 }
  0xe4   :  { %v926_v24 = vpop.f32.mrf.mxu0 }
  0xe5   :  { %v152_v29 = vmax.f32 %v146_v25, 0.0 }
  0xe6   :  { %v148_v26 = vpop.f32.mrf.mxu0 }
  0xe7   :  { %v149_v27 = vadd.f32 %v148_v26, %v56_v22  ;;  %v164_v32 = vmul.f32 %v152_v29, %v152_v29 }
  0xe8   :  { %v927_v28 = vpop.f32.mrf.mxu0 }
  0xe9   :  { %v153_v30 = vmax.f32 %v149_v27, 0.0 }
  0xeb   :  { %v155_v31 = vmul.f32 0.0, %v153_v30 }
  0xed   :  { %v156_v33 = vadd.f32 %v155_v31, %v152_v29  ;;  %v165_v34 = vmul.f32 %v155_v31, %v155_v31 }
  0xef   :  { %v157_v35 = vrot.slane %v156_v33, 4  ;;  %v166_v36 = vadd.f32 %v165_v34, %v164_v32 }
  0xf1   :  { %v158_v37 = vadd.f32 %v157_v35, %v156_v33  ;;  %v167_v38 = vrot.slane %v166_v36, 4 }
  0xf3   :  { %v159_v39 = vrot.slane %v158_v37, 2  ;;  %v168_v40 = vadd.f32 %v167_v38, %v166_v36 }
  0xf5   :  { %v160_v41 = vadd.f32 %v159_v39, %v158_v37  ;;  %v169_v42 = vrot.slane %v168_v40, 2 }
  0xf7   :  { %v161_v43 = vrot.slane %v160_v41, 1  ;;  %v170_v44 = vadd.f32 %v169_v42, %v168_v40 }
  0xf9   :  { %v162_v45 = vadd.f32 %v161_v43, %v160_v41  ;;  %v171_v46 = vrot.slane %v170_v44, 1 }
  0xfb   :  { %v163_v47 = vmul.f32 0.125, %v162_v45  ;;  %v172_v48 = vadd.f32 %v171_v46, %v170_v44 }
  0xfd   :  { %v173_v49 = vmul.f32 0.125, %v172_v48  ;;  %v174_v50 = vmul.f32 %v163_v47, %v163_v47 }
  0xff   :  { %v175_v51 = vsub.f32 %v173_v49, %v174_v50  ;;  %v342_v50 = vsub.s32 5, %v1171_v19 }
 0x101   :  { %v176_v52 = vmax.f32 %v175_v51, 0.0 }
 0x103   :  { %v177_v53 = vadd.f32 1e-05, %v176_v52 }
 0x105   :  { %1051 = vrsqrt.f32 %v177_v53 }
 0x112   :  { %v1052_v54 = vpop.eup %1051 }
 0x113   :  { %v179_v55 = vmul.f32 %v1052_v54, %v1177_v21 }
 0x115   :  { %v180_v57 = vmul.f32 %v179_v55, %v163_v47  ;;  %v188_v60 = vrot.slane %v179_v55, %v187_v56 }
 0x117   :  { %v182_v59 = vrot.slane %v180_v57, 4  ;;  %v189_v62 = vmul.f32 %v188_v60, %v152_v29  ;;  %v190_v63 = vmul.f32 %v188_v60, %v153_v30 }
 0x119   :  { %v184_v61 = vsub.f32 %v1185_v58, %v182_v59 }
 0x11b   :  { %v194_v1 = vrot.slane %v184_v61, %v55_v20 }
 0x11d   :  { %v1188_v2 = vadd.f32 %v194_v1, %v190_v63  ;;  %v1190_v3 = vadd.f32 %v194_v1, %v189_v62  ;;  %v1035_v1 = vld [vmem:[%s1336_s2 + $0xb8] sm:$0xff]  }
 0x11f   :  { %v213_v4 = vpack.c.bf16 %v1188_v2, %v1190_v3 }
 0x121   :  { %945 = vmatmul.mubr.bf16.vlgmr.msra.gmra.mxu1 %v213_v4  ;;  %v1036_v4 = vld [vmem:[%s1336_s2 + $0xb0] sm:$0xff]  }
 0x122   :  { %984 = vmatprep.mubr.msk.bf16.mxu1 %vm1060_vm0, %v1059_v0  ;;  %969 = vmatpush3.bf16.msra.mxu1 %v1035_v1  ;;  %v1047_v1 = vld [vmem:[%s1338_s3 + $0x18] sm:$0xff]  }
 0x123   :  { %970 = vmatprep.subr.bf16.mxu1 %v1059_v0 }
 0x126   :  { %971 = vmatpush3.bf16.msra.mxu1 %v1036_v4  ;;  %v1048_v4 = vld [vmem:[%s1338_s3 + $0x10] sm:$0xff]  }
 0x127   :  { %972 = vmatprep.subr.bf16.mxu1 %v1059_v0 }
 0x1e1   :  { %v300_v15 = vpop.f32.mrf.mxu1 }
 0x1e2   :  { %v301_v17 = vadd.f32 %v300_v15, %v217_v14 }
 0x1e3   :  { %v946_v16 = vpop.f32.mrf.mxu1 }
 0x1e4   :  { %v307_v23 = vmax.f32 %v301_v17, 0.0 }
 0x1e5   :  { %v303_v18 = vpop.f32.mrf.mxu1 }
 0x1e6   :  { %v304_v20 = vadd.f32 %v303_v18, %v217_v14  ;;  %v319_v26 = vmul.f32 %v307_v23, %v307_v23 }
 0x1e7   :  { %v947_v22 = vpop.f32.mrf.mxu1 }
 0x1e8   :  { %v308_v24 = vmax.f32 %v304_v20, 0.0 }
 0x1ea   :  { %v310_v25 = vmul.f32 0.0, %v308_v24 }
 0x1ec   :  { %v311_v27 = vadd.f32 %v310_v25, %v307_v23  ;;  %v320_v28 = vmul.f32 %v310_v25, %v310_v25 }
 0x1ee   :  { %v312_v29 = vrot.slane %v311_v27, 4  ;;  %v321_v30 = vadd.f32 %v320_v28, %v319_v26 }
 0x1f0   :  { %v313_v31 = vadd.f32 %v312_v29, %v311_v27  ;;  %v322_v32 = vrot.slane %v321_v30, 4 }
 0x1f2   :  { %v314_v33 = vrot.slane %v313_v31, 2  ;;  %v323_v34 = vadd.f32 %v322_v32, %v321_v30 }
 0x1f4   :  { %v315_v35 = vadd.f32 %v314_v33, %v313_v31  ;;  %v324_v36 = vrot.slane %v323_v34, 2 }
 0x1f6   :  { %v316_v37 = vrot.slane %v315_v35, 1  ;;  %v325_v38 = vadd.f32 %v324_v36, %v323_v34 }
 0x1f8   :  { %v317_v39 = vadd.f32 %v316_v37, %v315_v35  ;;  %v326_v40 = vrot.slane %v325_v38, 1 }
 0x1fa   :  { %v318_v41 = vmul.f32 0.125, %v317_v39  ;;  %v327_v42 = vadd.f32 %v326_v40, %v325_v38 }
 0x1fc   :  { %v328_v43 = vmul.f32 0.125, %v327_v42  ;;  %v329_v44 = vmul.f32 %v318_v41, %v318_v41 }
 0x1fe   :  { %v330_v45 = vsub.f32 %v328_v43, %v329_v44 }
 0x200   :  { %v331_v46 = vmax.f32 %v330_v45, 0.0 }
 0x202   :  { %v332_v47 = vadd.f32 1e-05, %v331_v46  ;;  %v500_v46 = vsub.s32 6, %v1171_v19 }
 0x204   :  { %1053 = vrsqrt.f32 %v332_v47 }
 0x211   :  { %v1054_v48 = vpop.eup %1053 }
 0x212   :  { %v334_v49 = vmul.f32 %v1054_v48, %v1177_v21 }
 0x214   :  { %v335_v51 = vmul.f32 %v334_v49, %v318_v41  ;;  %v343_v53 = vrot.slane %v334_v49, %v342_v50 }
 0x216   :  { %v337_v52 = vrot.slane %v335_v51, 4  ;;  %v344_v55 = vmul.f32 %v343_v53, %v307_v23  ;;  %v345_v56 = vmul.f32 %v343_v53, %v308_v24 }
 0x218   :  { %v339_v54 = vsub.f32 %v1185_v58, %v337_v52 }
 0x21a   :  { %v349_v57 = vrot.slane %v339_v54, %v216_v13 }
 0x21c   :  { %v1233_v59 = vadd.f32 %v349_v57, %v344_v55  ;;  %v1235_v60 = vadd.f32 %v349_v57, %v345_v56 }
 0x21e   :  { %v353_v61 = vadd.f32 %v1235_v60, %v1188_v2  ;;  %v352_v62 = vadd.f32 %v1233_v59, %v1190_v3  ;;  %v1037_v2 = vld [vmem:[%s1336_s2 + $0xa8] sm:$0xff]   ;;  %v1038_v3 = vld [vmem:[%s1336_s2 + $0xa0] sm:$0xff]  }
 0x21f   :  { %973 = vmatpush3.bf16.msra.mxu1 %v1037_v2  ;;  %v1049_v2 = vld [vmem:[%s1338_s3 + $0x8] sm:$0xff]  }
 0x220   :  { %v371_v63 = vpack.c.bf16 %v353_v61, %v352_v62  ;;  %974 = vmatprep.subr.bf16.mxu1 %v1059_v0  ;;  %v1043_v62 = vld [vmem:[%s1338_s3 + $0x38] sm:$0xff]  }
 0x222   :  { %965 = vmatmul.mubr.bf16.vlgmr.msra.gmra.mxu0 %v371_v63  ;;  %v1044_v63 = vld [vmem:[%s1338_s3 + $0x30] sm:$0xff]  }
 0x223   :  { %1004 = vmatprep.mubr.msk.bf16.mxu0 %vm1060_vm0, %v1059_v0  ;;  %975 = vmatpush3.bf16.msra.mxu1 %v1038_v3  ;;  %v1050_v3 = vld [vmem:[%s1338_s3] sm:$0xff]  }
 0x224   :  { %976 = vmatprep.subr.bf16.mxu1 %v1059_v0  ;;  %989 = vmatpush3.bf16.msra.mxu0 %v1043_v62 }
 0x225   :  { %990 = vmatprep.subr.bf16.mxu0 %v1059_v0 }
 0x227   :  { %977 = vmatpush3.bf16.msra.mxu1 %v1039_v5  ;;  %v532_v5 = vsub.s32 3, %v1171_v19 }
 0x228   :  { %978 = vmatprep.subr.bf16.mxu1 %v1059_v0  ;;  %991 = vmatpush3.bf16.msra.mxu0 %v1044_v63 }
 0x229   :  { %992 = vmatprep.subr.bf16.mxu0 %v1059_v0 }
 0x22b   :  { %979 = vmatpush3.bf16.msra.mxu1 %v1040_v6  ;;  %v533_v6 = vrot.slane %v1177_v21, %v532_v5 }
 0x22c   :  { %980 = vmatprep.subr.bf16.mxu1 %v1059_v0 }
 0x22f   :  { %981 = vmatpush3.bf16.msra.mxu1 %v1041_v7 }
 0x230   :  { %982 = vmatprep.subr.bf16.mxu1 %v1059_v0 }
 0x233   :  { %983 = vmatpush3.bf16.msra.mxu1 %v1042_v8 }
 0x2e2   :  { %v458_v11 = vpop.f32.mrf.mxu0 }
 0x2e3   :  { %v459_v13 = vadd.f32 %v458_v11, %v375_v10 }
 0x2e4   :  { %v966_v12 = vpop.f32.mrf.mxu0 }
 0x2e5   :  { %v465_v17 = vmax.f32 %v459_v13, 0.0 }
 0x2e6   :  { %v461_v14 = vpop.f32.mrf.mxu0 }
 0x2e7   :  { %v462_v15 = vadd.f32 %v461_v14, %v375_v10  ;;  %v477_v22 = vmul.f32 %v465_v17, %v465_v17 }
 0x2e8   :  { %v967_v16 = vpop.f32.mrf.mxu0 }
 0x2e9   :  { %v466_v18 = vmax.f32 %v462_v15, 0.0 }
 0x2eb   :  { %v468_v20 = vmul.f32 0.0, %v466_v18 }
 0x2ed   :  { %v469_v23 = vadd.f32 %v468_v20, %v465_v17  ;;  %v478_v24 = vmul.f32 %v468_v20, %v468_v20 }
 0x2ef   :  { %v470_v25 = vrot.slane %v469_v23, 4  ;;  %v479_v26 = vadd.f32 %v478_v24, %v477_v22 }
 0x2f1   :  { %v471_v27 = vadd.f32 %v470_v25, %v469_v23  ;;  %v480_v28 = vrot.slane %v479_v26, 4 }
 0x2f3   :  { %v472_v29 = vrot.slane %v471_v27, 2  ;;  %v481_v30 = vadd.f32 %v480_v28, %v479_v26 }
 0x2f5   :  { %v473_v31 = vadd.f32 %v472_v29, %v471_v27  ;;  %v482_v32 = vrot.slane %v481_v30, 2 }
 0x2f7   :  { %v474_v33 = vrot.slane %v473_v31, 1  ;;  %v483_v34 = vadd.f32 %v482_v32, %v481_v30 }
 0x2f9   :  { %v475_v35 = vadd.f32 %v474_v33, %v473_v31  ;;  %v484_v36 = vrot.slane %v483_v34, 1 }
 0x2fb   :  { %v476_v37 = vmul.f32 0.125, %v475_v35  ;;  %v485_v38 = vadd.f32 %v484_v36, %v483_v34 }
 0x2fd   :  { %v486_v39 = vmul.f32 0.125, %v485_v38  ;;  %v487_v40 = vmul.f32 %v476_v37, %v476_v37 }
 0x2ff   :  { %v488_v41 = vsub.f32 %v486_v39, %v487_v40 }
 0x301   :  { %v489_v42 = vmax.f32 %v488_v41, 0.0  ;;  %v658_v41 = vsub.s32 7, %v1171_v19  ;;  %v854_v19 = vld [vmem:[%s1339_s5] ss:$0 sm:$0xff] }
 0x303   :  { %v490_v43 = vadd.f32 1e-05, %v489_v42 }
 0x305   :  { %1055 = vrsqrt.f32 %v490_v43 }
 0x312   :  { %v1056_v44 = vpop.eup %1055 }
 0x313   :  { %v492_v45 = vmul.f32 %v1056_v44, %v1177_v21 }
 0x315   :  { %v493_v47 = vmul.f32 %v492_v45, %v476_v37  ;;  %v501_v49 = vrot.slane %v492_v45, %v500_v46 }
 0x317   :  { %v495_v48 = vrot.slane %v493_v47, 4  ;;  %v502_v51 = vmul.f32 %v501_v49, %v465_v17  ;;  %v503_v52 = vmul.f32 %v501_v49, %v466_v18 }
 0x319   :  { %v497_v50 = vsub.f32 %v1185_v58, %v495_v48 }
 0x31b   :  { %v507_v53 = vrot.slane %v497_v50, %v374_v9 }
 0x31d   :  { %v1279_v54 = vadd.f32 %v507_v53, %v502_v51  ;;  %v1281_v55 = vadd.f32 %v507_v53, %v503_v52 }
 0x31f   :  { %v511_v56 = vadd.f32 %v1281_v55, %v1235_v60  ;;  %v510_v57 = vadd.f32 %v1279_v54, %v1233_v59  ;;  %v1045_v59 = vld [vmem:[%s1338_s3 + $0x28] sm:$0xff]   ;;  %v1046_v60 = vld [vmem:[%s1338_s3 + $0x20] sm:$0xff]  }
 0x320   :  { %993 = vmatpush3.bf16.msra.mxu0 %v1045_v59 }
 0x321   :  { %v529_v61 = vpack.c.bf16 %v511_v56, %v510_v57  ;;  %994 = vmatprep.subr.bf16.mxu0 %v1059_v0 }
 0x323   :  { %985 = vmatmul.mubr.bf16.vlgmr.msra.gmra.mxu1 %v529_v61 }
 0x324   :  { %995 = vmatpush3.bf16.msra.mxu0 %v1046_v60 }
 0x325   :  { %996 = vmatprep.subr.bf16.mxu0 %v1059_v0 }
 0x328   :  { %997 = vmatpush3.bf16.msra.mxu0 %v1047_v1 }
 0x329   :  { %998 = vmatprep.subr.bf16.mxu0 %v1059_v0 }
 0x32c   :  { %999 = vmatpush3.bf16.msra.mxu0 %v1048_v4 }
 0x32d   :  { %1000 = vmatprep.subr.bf16.mxu0 %v1059_v0 }
 0x330   :  { %1001 = vmatpush3.bf16.msra.mxu0 %v1049_v2 }
 0x331   :  { %1002 = vmatprep.subr.bf16.mxu0 %v1059_v0 }
 0x334   :  { %1003 = vmatpush3.bf16.msra.mxu0 %v1050_v3 }
 0x3e3   :  { %v616_v7 = vpop.f32.mrf.mxu1 }
 0x3e4   :  { %v617_v9 = vadd.f32 %v616_v7, %v533_v6 }
 0x3e5   :  { %v986_v8 = vpop.f32.mrf.mxu1 }
 0x3e6   :  { %v623_v13 = vmax.f32 %v617_v9, 0.0 }
 0x3e7   :  { %v619_v10 = vpop.f32.mrf.mxu1 }
 0x3e8   :  { %v620_v11 = vadd.f32 %v619_v10, %v533_v6  ;;  %v635_v16 = vmul.f32 %v623_v13, %v623_v13 }
 0x3e9   :  { %v987_v12 = vpop.f32.mrf.mxu1 }
 0x3ea   :  { %v624_v14 = vmax.f32 %v620_v11, 0.0 }
 0x3ec   :  { %v626_v15 = vmul.f32 0.0, %v624_v14 }
 0x3ee   :  { %v627_v0 = vadd.f32 %v626_v15, %v623_v13  ;;  %v636_v17 = vmul.f32 %v626_v15, %v626_v15 }
 0x3f0   :  { %v628_v18 = vrot.slane %v627_v0, 4  ;;  %v637_v20 = vadd.f32 %v636_v17, %v635_v16 }
 0x3f2   :  { %v629_v22 = vadd.f32 %v628_v18, %v627_v0  ;;  %v638_v23 = vrot.slane %v637_v20, 4 }
 0x3f4   :  { %v630_v24 = vrot.slane %v629_v22, 2  ;;  %v639_v25 = vadd.f32 %v638_v23, %v637_v20 }
 0x3f6   :  { %v631_v26 = vadd.f32 %v630_v24, %v629_v22  ;;  %v640_v27 = vrot.slane %v639_v25, 2 }
 0x3f8   :  { %v632_v28 = vrot.slane %v631_v26, 1  ;;  %v641_v29 = vadd.f32 %v640_v27, %v639_v25 }
 0x3fa   :  { %v633_v30 = vadd.f32 %v632_v28, %v631_v26  ;;  %v642_v31 = vrot.slane %v641_v29, 1 }
 0x3fc   :  { %v634_v32 = vmul.f32 0.125, %v633_v30  ;;  %v643_v33 = vadd.f32 %v642_v31, %v641_v29 }
 0x3fe   :  { %v644_v34 = vmul.f32 0.125, %v643_v33  ;;  %v645_v35 = vmul.f32 %v634_v32, %v634_v32 }
 0x400   :  { %v646_v36 = vsub.f32 %v644_v34, %v645_v35 }
 0x402   :  { %v647_v37 = vmax.f32 %v646_v36, 0.0 }
 0x404   :  { %v648_v38 = vadd.f32 1e-05, %v647_v37 }
 0x406   :  { %1057 = vrsqrt.f32 %v648_v38 }
 0x413   :  { %v1058_v39 = vpop.eup %1057 }
 0x414   :  { %v650_v40 = vmul.f32 %v1058_v39, %v1177_v21 }
 0x416   :  { %v651_v42 = vmul.f32 %v650_v40, %v634_v32  ;;  %v659_v44 = vrot.slane %v650_v40, %v658_v41 }
 0x418   :  { %v653_v43 = vrot.slane %v651_v42, 4  ;;  %v660_v46 = vmul.f32 %v659_v44, %v623_v13  ;;  %v661_v47 = vmul.f32 %v659_v44, %v624_v14 }
 0x41a   :  { %v655_v45 = vsub.f32 %v1185_v58, %v653_v43 }
 0x41c   :  { %v665_v48 = vrot.slane %v655_v45, %v532_v5 }
 0x41e   :  { %v666_v49 = vadd.f32 %v665_v48, %v660_v46  ;;  %v667_v50 = vadd.f32 %v665_v48, %v661_v47 }
 0x420   :  { %v669_v51 = vadd.f32 %v667_v50, %v1281_v55  ;;  %v668_v52 = vadd.f32 %v666_v49, %v1279_v54 }
 0x422   :  { %v687_v53 = vpack.c.bf16 %v669_v51, %v668_v52 }
 0x424   :  { %1005 = vmatmul.mubr.bf16.vlgmr.msra.gmra.mxu0 %v687_v53 }
 0x4e4   :  { %v776_v21 = vpop.f32.mrf.mxu0 }
 0x4e5   :  { %v777_v56 = vadd.f32 %v854_v19, %v776_v21 }
 0x4e6   :  { %v1006_v57 = vpop.f32.mrf.mxu0 }
 0x4e7   :  { %783 = vst [vmem:[%s1340_s6] sm:$0xff] %v777_v56 }
 0x4e8   :  { %v779_v58 = vpop.f32.mrf.mxu0 }
 0x4e9   :  { %v780_v61 = vadd.f32 %v854_v19, %v779_v58 }
 0x4ea   :  { %v1007_v62 = vpop.f32.mrf.mxu0 }
 0x4eb   :  { %784 = vst [vmem:[%s1340_s6 + $0x8] sm:$0xff] %v780_v61 }

</bundles_post_ra>
